<compile_context>
chip_gen: v7x
topology: tpu7x:2x2x1
jax: 0.10.0
libtpu: 0.0.40
codegen_flags: <defaults>
</compile_context>

<pallas_src>
import jax
import jax.numpy as jnp
from jax.experimental import pallas as pl
from jax.experimental.pallas import tpu as pltpu


_LANE = 128
_SUBLANE = 8
_TARGET_TILE_BYTES = 2 << 20   # ~2 MiB per-input tile: near HBM roofline, fits all gens
_PREF_ROWS = 32                # preferred row count when picking the lane width
_MAX_BLOCK_V = 65536           # lane cap -> (8, block_v) f32 accumulator <= 2 MiB
_MAX_BLOCK_B = 2048            # row cap -> bounded in-kernel row-chunk loop


def _round_up(x, m):
    return (x + m - 1) // m * m


def _choose_blocks(B, V, itemsize, target_bytes):
    """Pick (block_b, block_v): block_b multiple of 8, block_v multiple of 128.

    Wide-first on the lane axis (each per-row DMA segment stays >= a few KiB
    contiguous), rows chosen to reach ~target_bytes per input tile, and block_v
    widened again if a small B pins block_b.  Ragged edges are masked in-kernel,
    so 128/8 alignment padding costs nothing extra.
    """
    Bp8 = _round_up(B, _SUBLANE)
    Vp128 = _round_up(V, _LANE)

    pref_width = _round_up(max(_LANE, target_bytes // (_PREF_ROWS * itemsize)), _LANE)
    block_v = min(Vp128, pref_width, _MAX_BLOCK_V)

    rows = max(_SUBLANE, target_bytes // (block_v * itemsize))
    block_b = min(_round_up(rows, _SUBLANE), Bp8, _MAX_BLOCK_B)

    if block_b * block_v * itemsize < target_bytes and block_v < min(Vp128, _MAX_BLOCK_V):
        want = _round_up(target_bytes // (block_b * itemsize), _LANE)
        block_v = min(max(block_v, want), Vp128, _MAX_BLOCK_V)

    return block_b, block_v


def _vmem_limit_bytes(in_tile_bytes, out_tile_bytes, scratch_bytes):
    needed = (2 * 2 * in_tile_bytes     # 2 inputs x 2 pipeline buffers
              + 2 * out_tile_bytes      # output double buffer
              + scratch_bytes           # in-kernel f32 intermediates
              + (6 << 20))              # headroom
    try:
        cap = int(pltpu.get_tpu_info().vmem_capacity_bytes)
    except Exception:
        cap = 64 << 20                  # conservative: v7x per-TC physical VMEM
    return int(min(max(needed, 24 << 20), cap - (8 << 20)))


# ---------------------------------------------------------------------------
# Sum path: each grid point writes an (8, 128) f32 partial-sum tile of |p - q|
# (the /2 and the tiny final reduce happen in the wrapper).  Ragged row/col
# edges are masked in-kernel; masks are only emitted when B/V are not block
# aligned (static decision).
# ---------------------------------------------------------------------------
def _make_partial_sum_kernel(B, V, block_b, block_v, b_axis, v_axis):
    n_row_chunks = block_b // _SUBLANE
    n_lane_groups = block_v // _LANE
    mask_rows = (B % block_b) != 0
    mask_cols = (V % block_v) != 0

    def kernel(p_ref, q_ref, out_ref):
        i = pl.program_id(b_axis)
        j = pl.program_id(v_axis)
        row0 = i * block_b

        def chunk(start, acc):
            # 8-row chunk: |p - q| in the input dtype, upcast to f32 only for
            # accumulation (no full-tile f32 intermediate is ever materialized).
            pc = p_ref[pl.ds(start, _SUBLANE), :]
            qc = q_ref[pl.ds(start, _SUBLANE), :]
            d = jnp.abs(pc - qc).astype(jnp.float32)
            if mask_rows:
                rid = (row0 + start
                       + jax.lax.broadcasted_iota(jnp.int32, (_SUBLANE, block_v), 0))
                d = jnp.where(rid < B, d, 0.0)
            return acc + d

        acc = jnp.zeros((_SUBLANE, block_v), jnp.float32)
        if n_row_chunks <= 16:
            for r in range(n_row_chunks):           # short: fully unrolled
                acc = chunk(r * _SUBLANE, acc)
        else:
            acc = jax.lax.fori_loop(
                0, n_row_chunks,
                lambda r, a: chunk(pl.multiple_of(r * _SUBLANE, _SUBLANE), a),
                acc)

        if mask_cols:
            cid = (j * block_v
                   + jax.lax.broadcasted_iota(jnp.int32, (_SUBLANE, block_v), 1))
            acc = jnp.where(cid < V, acc, 0.0)

        # Fold lane groups (8, block_v) -> (8, 128) with vreg-aligned static
        # slices, pairwise to keep the dependency chain short.
        parts = [acc[:, c * _LANE:(c + 1) * _LANE] for c in range(n_lane_groups)]
        while len(parts) > 1:
            nxt = [parts[k] + parts[k + 1] for k in range(0, len(parts) - 1, 2)]
            if len(parts) % 2:
                nxt.append(parts[-1])
            parts = nxt
        out_ref[...] = parts[0]

    return kernel


# ---------------------------------------------------------------------------
# Elementwise path for reduction='none': out = |p - q| / 2.  Boundary blocks
# are clipped on write-back by Pallas, so no masking / padding is needed.
# ---------------------------------------------------------------------------
def _tvd_elementwise_kernel(p_ref, q_ref, out_ref):
    out_ref[...] = (jnp.abs(p_ref[...] - q_ref[...]) * 0.5).astype(out_ref.dtype)


def tvd_loss(p, q, reduction="batchmean", *, target_tile_bytes=_TARGET_TILE_BYTES):
    """Pallas TPU implementation of TorchTVDLoss.forward for 2-D (B, V) inputs."""
    if p.shape != q.shape or p.ndim != 2:
        raise ValueError("expected matching 2-D (batch, vocab) inputs")
    if reduction not in ("batchmean", "mean", "sum", "none"):
        raise ValueError("Invalid reduction type.")

    B, V = p.shape
    itemsize = jnp.dtype(p.dtype).itemsize
    block_b, block_v = _choose_blocks(B, V, itemsize, target_tile_bytes)
    grid_b = pl.cdiv(B, block_b)
    grid_v = pl.cdiv(V, block_v)

    # Put the axis with more blocks first so megacore sharding (v7x: 2 TCs)
    # always has >= 2 blocks along the leading parallel axis.
    if grid_v > grid_b:
        grid = (grid_v, grid_b)
        b_axis, v_axis = 1, 0
        idx = lambda j, i: (i, j)
    else:
        grid = (grid_b, grid_v)
        b_axis, v_axis = 0, 1
        idx = lambda i, j: (i, j)

    in_specs = [pl.BlockSpec((block_b, block_v), idx),
                pl.BlockSpec((block_b, block_v), idx)]
    in_tile_bytes = block_b * block_v * itemsize

    if reduction == "none":
        compiler_params = pltpu.CompilerParams(
            dimension_semantics=("parallel", "parallel"),
            vmem_limit_bytes=_vmem_limit_bytes(in_tile_bytes, in_tile_bytes,
                                               2 * in_tile_bytes))
        return pl.pallas_call(
            _tvd_elementwise_kernel,
            out_shape=jax.ShapeDtypeStruct((B, V), p.dtype),
            grid_spec=pltpu.PrefetchScalarGridSpec(
                num_scalar_prefetch=0,
                grid=grid,
                in_specs=in_specs,
                out_specs=pl.BlockSpec((block_b, block_v), idx),
            ),
            compiler_params=compiler_params,
            cost_estimate=pl.CostEstimate(
                flops=2 * B * V, transcendentals=0,
                bytes_accessed=3 * B * V * itemsize),
        )(p, q)

    # sum / mean / batchmean: per-block (8, 128) f32 partial sums, tiny final
    # reduce (+ the /2 factor) in the JAX wrapper.
    scratch_bytes = 4 * _SUBLANE * block_v * 4   # f32 accumulator + chunk temps
    compiler_params = pltpu.CompilerParams(
        dimension_semantics=("parallel", "parallel"),
        vmem_limit_bytes=_vmem_limit_bytes(in_tile_bytes,
                                           _SUBLANE * _LANE * 4,
                                           scratch_bytes))
    kernel = _make_partial_sum_kernel(B, V, block_b, block_v, b_axis, v_axis)
    partials = pl.pallas_call(
        kernel,
        out_shape=jax.ShapeDtypeStruct(
            (grid_b * _SUBLANE, grid_v * _LANE), jnp.float32),
        grid_spec=pltpu.PrefetchScalarGridSpec(
            num_scalar_prefetch=0,
            grid=grid,
            in_specs=in_specs,
            out_specs=pl.BlockSpec((_SUBLANE, _LANE), idx),
        ),
        compiler_params=compiler_params,
        cost_estimate=pl.CostEstimate(
            flops=3 * B * V, transcendentals=0,
            bytes_accessed=2 * B * V * itemsize
                           + grid_b * grid_v * _SUBLANE * _LANE * 4),
    )(p, q)

    total = jnp.sum(partials) * 0.5  # the |.|/2 factor, applied once

    if reduction == "sum":
        return total
    if reduction == "mean":
        return total / (B * V)
    return total / B  # batchmean


if __name__ == "__main__":
    key = jax.random.PRNGKey(0)
    k1, k2, k3, k4, k5, k6 = jax.random.split(key, 6)

    # Case 1: nicely-shaped distributions (single aligned block, no masking).
    B, V = 8, 256
    p = jax.nn.softmax(jax.random.normal(k1, (B, V), dtype=jnp.float32), axis=-1)
    q = jax.nn.softmax(jax.random.normal(k2, (B, V), dtype=jnp.float32), axis=-1)

    out = jax.block_until_ready(tvd_loss(p, q, reduction="batchmean"))
    ref = jnp.sum(jnp.abs(p - q) / 2.0) / B
    assert jnp.allclose(out, ref, rtol=1e-5, atol=1e-6), (out, ref)

    out_none = jax.block_until_ready(tvd_loss(p, q, reduction="none"))
    assert jnp.allclose(out_none, jnp.abs(p - q) / 2.0, rtol=1e-5, atol=1e-6)

    # Case 2: awkward shape -> in-kernel row/col edge masking (no jnp.pad).
    B2, V2 = 6, 300
    p2 = jax.nn.softmax(jax.random.normal(k3, (B2, V2), dtype=jnp.float32), axis=-1)
    q2 = jax.nn.softmax(jax.random.normal(k4, (B2, V2), dtype=jnp.float32), axis=-1)

    out_sum = jax.block_until_ready(tvd_loss(p2, q2, reduction="sum"))
    ref_sum = jnp.sum(jnp.abs(p2 - q2) / 2.0)
    assert jnp.allclose(out_sum, ref_sum, rtol=1e-5, atol=1e-6), (out_sum, ref_sum)

    out_mean = jax.block_until_ready(tvd_loss(p2, q2, reduction="mean"))
    assert jnp.allclose(out_mean, ref_sum / (B2 * V2), rtol=1e-5, atol=1e-6)

    out_none2 = jax.block_until_ready(tvd_loss(p2, q2, reduction="none"))
    assert out_none2.shape == (B2, V2)
    assert jnp.allclose(out_none2, jnp.abs(p2 - q2) / 2.0, rtol=1e-5, atol=1e-6)

    # Case 3: tiny tile target to force a multi-block grid with edge masks on
    # both axes and the vocab-major grid ordering (exercises the v7x path).
    B3, V3 = 20, 700
    p3 = jax.nn.softmax(jax.random.normal(k5, (B3, V3), dtype=jnp.float32), axis=-1)
    q3 = jax.nn.softmax(jax.random.normal(k6, (B3, V3), dtype=jnp.float32), axis=-1)
    out3 = jax.block_until_ready(
        tvd_loss(p3, q3, reduction="batchmean", target_tile_bytes=32 * 1024))
    ref3 = jnp.sum(jnp.abs(p3 - q3) / 2.0) / B3
    assert jnp.allclose(out3, ref3, rtol=1e-5, atol=1e-6), (out3, ref3)

    # Case 4: bf16 inputs (elementwise math in bf16, accumulation in f32).
    pb = p.astype(jnp.bfloat16)
    qb = q.astype(jnp.bfloat16)
    out_bf = jax.block_until_ready(tvd_loss(pb, qb, reduction="sum"))
    ref_bf = jnp.sum(jnp.abs(pb - qb).astype(jnp.float32)) * 0.5
    assert jnp.allclose(out_bf, ref_bf, rtol=1e-3, atol=1e-4), (out_bf, ref_bf)

    print("KERNEL_OK")
</pallas_src>

<mosaic_0001>
module attributes {stable_mosaic.version = 11 : i64} {
  func.func @kernel(%arg0: i32, %arg1: i32, %arg2: memref<8x256xf32, #tpu.memory_space<vmem>>, %arg3: memref<8x256xf32, #tpu.memory_space<vmem>>, %arg4: memref<8x128xf32, #tpu.memory_space<vmem>>) attributes {dimension_semantics = [#tpu.dimension_semantics<parallel>, #tpu.dimension_semantics<parallel>], iteration_bounds = array<i64: 1, 1>, scalar_prefetch = 0 : i64, scratch_operands = 0 : i64, tpu.core_type = #tpu.core_type<tc>, window_params = [{transform_indices = @transform_0, window_bounds = array<i64: 8, 256>}, {transform_indices = @transform_1, window_bounds = array<i64: 8, 256>}, {transform_indices = @transform_2, window_bounds = array<i64: 8, 128>}]} {
    %cst = arith.constant 0.000000e+00 : f32
    %0 = vector.broadcast %cst : f32 to vector<8x256xf32>
    %c0 = arith.constant 0 : index
    %c0_0 = arith.constant 0 : index
    %1 = vector.load %arg2[%c0, %c0_0] : memref<8x256xf32, #tpu.memory_space<vmem>>, vector<8x256xf32>
    %c0_1 = arith.constant 0 : index
    %c0_2 = arith.constant 0 : index
    %2 = vector.load %arg3[%c0_1, %c0_2] : memref<8x256xf32, #tpu.memory_space<vmem>>, vector<8x256xf32>
    %3 = arith.subf %1, %2 : vector<8x256xf32>
    %4 = math.absf %3 : vector<8x256xf32>
    %5 = arith.addf %0, %4 : vector<8x256xf32>
    %6 = vector.extract_strided_slice %5 {offsets = [0, 0], sizes = [8, 128], strides = [1, 1]} : vector<8x256xf32> to vector<8x128xf32>
    %7 = vector.extract_strided_slice %5 {offsets = [0, 128], sizes = [8, 128], strides = [1, 1]} : vector<8x256xf32> to vector<8x128xf32>
    %8 = arith.addf %6, %7 : vector<8x128xf32>
    %c0_3 = arith.constant 0 : index
    %c0_4 = arith.constant 0 : index
    %9 = vector.load %arg4[%c0_3, %c0_4] : memref<8x128xf32, #tpu.memory_space<vmem>>, vector<8x128xf32>
    tpu.vector_store %arg4[%c0_3, %c0_4], %8 {strides = array<i32>} : memref<8x128xf32, #tpu.memory_space<vmem>>, vector<8x128xf32>,
    return
  }
  func.func @transform_0(%arg0: i32, %arg1: i32) -> (i32, i32) {
    %c0_i32 = arith.constant 0 : i32
    return %arg0, %arg1 : i32, i32
  }
  func.func @transform_1(%arg0: i32, %arg1: i32) -> (i32, i32) {
    %c0_i32 = arith.constant 0 : i32
    return %arg0, %arg1 : i32, i32
  }
  func.func @transform_2(%arg0: i32, %arg1: i32) -> (i32, i32) {
    %c0_i32 = arith.constant 0 : i32
    return %arg0, %arg1 : i32, i32
  }
}

</mosaic_0001>

<bundles_post_ra>
// kernel: tpu_custom_call.1
= control target key start
LH: loop header
LB: loop body
LE: loop exit
PB: predicated region body
PF: predicated region fallthrough
CT: control target
= control target key end

     0   :  { %7 = vsyncpa [#allocation3], 0  ;;  %s193_s0 = inlined_call_operand.hbm [shape: f32[8,256], index: 0, kind: input, shape index: {}]   ;;  %s194_s1 = inlined_call_operand.hbm [shape: f32[8,256], index: 1, kind: input, shape index: {}]   ;;  %s195_s2 = inlined_call_operand.hbm [shape: f32[8,128], index: 2, kind: output, shape index: {}]  }
   0x1   :  { %8 = vsyncpa [#allocation6], 0 }
   0x2   :  { %9 = vsyncpa [#allocation4], 0  ;;  %s139_s9 = smov [#allocation2]   ;;  %s140_s11 = smov [#allocation5]  }
   0x3   :  { %s16_s10 = sshll.u32 %s139_s9, 4  ;;  %s26_s12 = sshll.u32 %s140_s11, 4  ;;  %s17_s10 = int_to_ptr.vmem [resolvable:$true] %s16_s10  ;;  %s27_s12 = int_to_ptr.vmem [resolvable:$true] %s26_s12 }
   0x4   :  { %s67_s15 = scalar_lea.hbm %s193_s0, 256 }
   0x5   :  { %p68_p0 = scmp.ne.s32.totalorder %s193_s0, %s67_s15  ;;  %p71_p1 = scmp.lt.u32.totalorder %s67_s15, %s193_s0 }
   0x7   :  { %p73_p2 = pnand %p71_p1, %p68_p0 }
   0x9   :  { %76 = shalt.err (!%p73_p2)
}
   0xa   :  { %s77_s20 = scalar_lea.vmem %s17_s10, 256  ;;  %p82_p4 = scmp.lt.s32.totalorder %s17_s10, %s17_s10 }
   0xb   :  { %p78_p3 = scmp.ne.s32.totalorder %s17_s10, %s77_s20  ;;  %p83_p5 = scmp.lt.s32.totalorder %s77_s20, %s77_s20 }
   0xd   :  { %p84_p6 = por %p83_p5, %p82_p4 }
   0xf   :  { %p85_p7 = pnand %p84_p6, %p78_p3 }
  0x11   :  { %88 = shalt.err (!%p85_p7)
}
  0x12   :  { %19 = dma.hbm_to_vmem [thread:$0]  %s193_s0, 256, %s17_s10, [#allocation3]  }
  0x13   :  { %s89_s25 = scalar_lea.hbm %s194_s1, 256 }
  0x14   :  { %p90_p8 = scmp.ne.s32.totalorder %s194_s1, %s89_s25  ;;  %p93_p9 = scmp.lt.u32.totalorder %s89_s25, %s194_s1 }
  0x16   :  { %p95_p10 = pnand %p93_p9, %p90_p8 }
  0x18   :  { %98 = shalt.err (!%p95_p10)
}
  0x19   :  { %s99_s30 = scalar_lea.vmem %s27_s12, 256  ;;  %p104_p12 = scmp.lt.s32.totalorder %s27_s12, %s27_s12 }
  0x1a   :  { %p100_p11 = scmp.ne.s32.totalorder %s27_s12, %s99_s30  ;;  %p105_p13 = scmp.lt.s32.totalorder %s99_s30, %s99_s30 }
  0x1c   :  { %p106_p0 = por %p105_p13, %p104_p12 }
  0x1e   :  { %p107_p1 = pnand %p106_p0, %p100_p11 }
  0x20   :  { %110 = shalt.err (!%p107_p1)
}
  0x21   :  { %29 = dma.hbm_to_vmem [thread:$0]  %s194_s1, 256, %s27_s12, [#allocation6]  }
  0x22   :  { %133 = dma.done.wait [#allocation3], 256  }
  0x23   :  { %134 = vsyncadd [#allocation3], 4294967040 }
  0x24   :  { %135 = dma.done.wait [#allocation6], 256  }
  0x25   :  { %136 = vsyncadd [#allocation6], 4294967040  ;;  %v36_v0 = vld [vmem:[#allocation2] sm:$0xff]  ;;  %v37_v1 = vld [vmem:[#allocation2 + $0x8] sm:$0xff]  ;;  %s141_s4 = smov [#allocation7]  }
  0x26   :  { %v38_v2 = vld [vmem:[#allocation5] sm:$0xff]  ;;  %v39_v3 = vld [vmem:[#allocation5 + $0x8] sm:$0xff]  ;;  %s54_s5 = sshll.u32 %s141_s4, 4  ;;  %s55_s5 = int_to_ptr.vmem [resolvable:$true] %s54_s5 }
  0x27   :  { %v40_v4 = vsub.f32 %v36_v0, %v38_v2  ;;  %v41_v5 = vsub.f32 %v37_v1, %v39_v3  ;;  %s111_s6 = scalar_lea.vmem %s55_s5, 128  ;;  %p116_p3 = scmp.lt.s32.totalorder %s55_s5, %s55_s5 }
  0x28   :  { %p112_p2 = scmp.ne.s32.totalorder %s55_s5, %s111_s6  ;;  %p117_p4 = scmp.lt.s32.totalorder %s111_s6, %s111_s6 }
  0x29   :  { %v42_v6 = vand.u32 2147483647, %v40_v4  ;;  %v43_v7 = vand.u32 2147483647, %v41_v5 }
  0x2a   :  { %p118_p5 = por %p117_p4, %p116_p3 }
  0x2b   :  { %v46_v8 = vadd.f32 %v43_v7, %v42_v6 }
  0x2c   :  { %p119_p6 = pnand %p118_p5, %p112_p2 }
  0x2d   :  { %47 = vst [vmem:[#allocation7] sm:$0xff] %v46_v8 }
  0x2e   :  { %122 = shalt.err (!%p119_p6)
}
  0x2f   :  { %s123_s8 = scalar_lea.hbm %s195_s2, 128 }
  0x30   :  { %p124_p7 = scmp.ne.s32.totalorder %s195_s2, %s123_s8  ;;  %p127_p8 = scmp.lt.u32.totalorder %s123_s8, %s195_s2 }
  0x32   :  { %p129_p9 = pnand %p127_p8, %p124_p7 }
  0x34   :  { %132 = shalt.err (!%p129_p9)
}
  0x35   :  { %57 = dma.vmem_to_hbm [thread:$0]  %s55_s5, 128, %s195_s2, [#allocation4]  }
  0x36   :  { %137 = dma.done.wait [#allocation4], 128  }
  0x37   :  { %138 = vsyncadd [#allocation4], 4294967168 }
  0x38   :  { %61 = vsyncpa [#allocation3], 1 }
  0x39   :  { %62 = vsyncpa [#allocation6], 1 }
  0x3a   :  { %63 = vsyncpa [#allocation4], 1 }

</bundles_post_ra>
